<compile_context>
chip_gen: v6e
topology: v6e:2x2x1
jax: 0.10.0
libtpu: 0.0.40
codegen_flags: <defaults>
</compile_context>

<pallas_src>
import functools

import jax
import jax.numpy as jnp
import numpy as np
from jax import lax
from jax.experimental import pallas as pl
from jax.experimental.pallas import tpu as pltpu

BETA = 0.25  # commitment cost of the underlying VectorQuantizer


def _round_up(x, m):
    return ((x + m - 1) // m) * m


def _cdiv(a, b):
    return (a + b - 1) // b


def _rvq_kernel(x_ref, cbT_ref, cnh_ref, xq_ref, idx_ref, loss_ref, *,
                n_tokens, use_bf16_scores):
    # x_ref:   (TN, D)       float        — token tile (last tile may be partial)
    # cbT_ref: (L, D, n_e)   f32          — transposed codebooks (VMEM resident)
    # cnh_ref: (L, 1, n_e)   f32          — precomputed 0.5*||c||^2 per level
    # xq_ref:  (TN, D)       float        — quantized output tile
    # idx_ref: (L, TN)       int32        — lane-dense per-level indices
    # loss_ref:(1, 8, 128)   f32          — per-tile partial SSE (broadcast)
    TN, D = x_ref.shape
    L, _, n_e = cbT_ref.shape

    x = x_ref[...].astype(jnp.float32)
    residual = x
    x_q = jnp.zeros_like(x)
    loss_sum = jnp.float32(0.0)

    code_iota = lax.broadcasted_iota(jnp.int32, (TN, n_e), 1)           # (TN, n_e)
    # bf16 is exact for the 0/1 one-hot and integer code ids up to 256.
    idx_mm_dtype = jnp.bfloat16 if n_e <= 256 else jnp.float32
    iota_row = lax.broadcasted_iota(jnp.int32, (1, n_e), 1).astype(idx_mm_dtype)

    score_dtype = jnp.bfloat16 if use_bf16_scores else jnp.float32

    # Only the (possibly partial) last tile needs a validity mask; n_tokens is a
    # static Python int so this is resolved at trace time when N % TN == 0.
    needs_mask = (n_tokens % TN) != 0
    if needs_mask:
        row_ids = (pl.program_id(0) * TN
                   + lax.broadcasted_iota(jnp.int32, (TN, 1), 0))        # (TN, 1)
        valid = row_ids < n_tokens

    # L is small and static -> unrolled Python loop; each level is MXU matmuls
    # plus lane reductions, all on VMEM-resident data.
    for l in range(L):
        cbT = cbT_ref[l]                                                 # (D, n_e) f32

        # r.c scores. bf16 operands give full-rate MXU on v6e/v7x; f32 accumulate.
        scores = jnp.dot(residual.astype(score_dtype), cbT.astype(score_dtype),
                         preferred_element_type=jnp.float32)             # (TN, n_e)

        # ||r||^2 is constant per row -> dropped; norm is pre-halved so this is
        # a single VALU pass (no f32 FMA on v5e/v6e).
        d = cnh_ref[l] - scores                                          # (TN, n_e)

        # argmin with first-occurrence tie-breaking (matches torch.argmin).
        d_min = jnp.min(d, axis=1, keepdims=True)                        # (TN, 1)
        idx = jnp.min(jnp.where(d == d_min, code_iota, n_e),
                      axis=1, keepdims=True).astype(jnp.int32)           # (TN, 1)

        # Gather codewords via one-hot matmul (MXU). Kept in f32: the one-hot is
        # exact 0/1 so quantized values equal the f32 codebook rows exactly.
        onehot = (code_iota == idx)
        quant = lax.dot_general(onehot.astype(jnp.float32), cbT,
                                (((1,), (1,)), ((), ())),
                                preferred_element_type=jnp.float32)      # (TN, D)

        # Lane-dense index row: iota_row @ onehot^T is already (1, TN) -> no
        # cross-lane relayout, unmasked store. Exact small integers.
        idx_row = lax.dot_general(iota_row, onehot.astype(idx_mm_dtype),
                                  (((1,), (1,)), ((), ())),
                                  preferred_element_type=jnp.float32)    # (1, TN)
        idx_ref[pl.ds(l, 1), :] = idx_row.astype(jnp.int32)

        # Raw SSE only; (1+beta)/(L*N*D) normalization happens in the wrapper
        # with the global N. jnp.where (not multiply) so stale/NaN data in the
        # out-of-bounds rows of a partial last tile can never propagate.
        diff = quant - residual
        sq = diff * diff
        if needs_mask:
            sq = jnp.where(valid, sq, 0.0)
        loss_sum = loss_sum + jnp.sum(sq)

        x_q = x_q + quant
        residual = residual - quant

    xq_ref[...] = x_q.astype(xq_ref.dtype)
    loss_ref[...] = jnp.zeros(loss_ref.shape, jnp.float32) + loss_sum


def _select_tile_rows(N, block_rows):
    """Token tile size.

    Small N -> one small tile (sublane-aligned). Otherwise aim for >= 2 tiles so
    both v7x TensorCores get work, capped at block_rows for VMEM headroom.
    """
    if N <= 128:
        return _round_up(max(N, 8), 8)
    tn = min(_round_up(block_rows, 128), _round_up(_cdiv(N, 2), 128))
    return max(tn, 128)


def residual_vq_forward(x, codebooks, *, block_rows=2048, use_bf16_scores=True):
    """x: (N, D). codebooks: (L, n_e, D). Returns (x_q, mean_loss, indices (N, L)).

    block_rows: max token-tile size (multiple of 128). 2048 amortizes the
    ~0.35 us per-grid-step cost while staying far under every generation's
    VMEM budget (vmem_limit_bytes is set explicitly below, capped at 64 MiB
    for v7x).  use_bf16_scores=False gives argmin bit-faithful to the f32
    torch reference (bf16 may flip near-exact ties).
    """
    N, D = x.shape
    L, n_e, _ = codebooks.shape

    cbT = jnp.transpose(codebooks, (0, 2, 1)).astype(jnp.float32)        # (L, D, n_e)
    cn_half = 0.5 * jnp.sum(cbT * cbT, axis=1, keepdims=True)            # (L, 1, n_e)

    TN = _select_tile_rows(N, block_rows)
    num_tiles = _cdiv(N, TN)

    # Explicit VMEM budget: x/xq/idx blocks double-buffered, resident codebooks,
    # plus a generous estimate of the per-level (TN, n_e)/(TN, D) transients.
    itemsize = 4
    transients = (8 * TN * n_e + 12 * TN * D) * itemsize
    pipelined = (2 * (2 * TN * D + L * TN) + 2 * (L * D * n_e + L * n_e)
                 + 2 * 8 * 128) * itemsize
    vmem_limit = int(min(max(2 * (transients + pipelined) + (4 << 20), 32 << 20),
                         64 << 20))

    grid_spec = pltpu.PrefetchScalarGridSpec(
        num_scalar_prefetch=0,
        grid=(num_tiles,),
        in_specs=[
            pl.BlockSpec((TN, D), lambda i: (i, 0)),            # x tile
            pl.BlockSpec((L, D, n_e), lambda i: (0, 0, 0)),     # codebooks (resident)
            pl.BlockSpec((L, 1, n_e), lambda i: (0, 0, 0)),     # 0.5*||c||^2 (resident)
        ],
        out_specs=(
            pl.BlockSpec((TN, D), lambda i: (i, 0)),            # x_q tile
            pl.BlockSpec((L, TN), lambda i: (0, i)),            # lane-dense indices
            pl.BlockSpec((1, 8, 128), lambda i: (i, 0, 0)),     # per-tile loss partial
        ),
    )
    out_shape = (
        jax.ShapeDtypeStruct((N, D), x.dtype),
        jax.ShapeDtypeStruct((L, N), jnp.int32),
        jax.ShapeDtypeStruct((num_tiles, 8, 128), jnp.float32),
    )

    xq, idx_ln, loss_part = pl.pallas_call(
        functools.partial(_rvq_kernel, n_tokens=N,
                          use_bf16_scores=use_bf16_scores),
        grid_spec=grid_spec,
        out_shape=out_shape,
        compiler_params=pltpu.CompilerParams(
            dimension_semantics=("parallel",),
            vmem_limit_bytes=vmem_limit),
    )(x, cbT, cn_half)

    mean_loss = jnp.sum(loss_part[:, 0, 0]) * ((1.0 + BETA) / (L * N * D))
    # Consumers that accept the (L, N) layout can use idx_ln directly and skip
    # this transpose (an extra HBM round trip).
    indices = jnp.transpose(idx_ln)                                      # (N, L)
    return xq, mean_loss, indices


def residual_vq_reference(x, codebooks, beta=BETA):
    """Pure-JAX reference mirroring the PyTorch forward (values only).

    The argmin uses the ||r||^2-free form, which is mathematically identical to
    argmin_k(||r||^2 + ||c_k||^2 - 2 r.c_k) used by the torch module.
    """
    residual = x.astype(jnp.float32)
    x_q = jnp.zeros_like(residual)
    losses, indices = [], []
    for l in range(codebooks.shape[0]):
        cb = codebooks[l].astype(jnp.float32)
        d = jnp.sum(cb ** 2, axis=1)[None, :] - 2.0 * residual @ cb.T
        idx = jnp.argmin(d, axis=1)
        quant = cb[idx]
        losses.append((1.0 + beta) * jnp.mean((quant - residual) ** 2))
        x_q = x_q + quant
        residual = residual - quant
        indices.append(idx.astype(jnp.int32))
    return x_q, jnp.mean(jnp.stack(losses)), jnp.stack(indices, axis=-1)


# TODO(synk): Sinkhorn-Knopp balanced assignment (sk_epsilon > 0), EMA/Gumbel
# quantizer variants, and .detach()/straight-through gradient plumbing have no
# forward-value effect here and are not implemented (forward-only kernel).
# TODO(synk): folded (N,32)->(N/4,128) layout with a block-diagonal codebook
# (fixes D=32 lane under-utilization) is deferred until profiling shows the
# VALU / store slots binding.

if __name__ == "__main__":
    # Small, module-consistent shapes: L=3 residual levels, codebook size 128,
    # embedding dim 32, 16 flattened tokens.
    N, D, n_e, L = 16, 32, 128, 3

    key = jax.random.PRNGKey(0)
    kx, kc, kx2, kx3 = jax.random.split(key, 4)
    x = jax.random.normal(kx, (N, D), dtype=jnp.float32)
    # Deterministic nn.Embedding-style init: uniform(-1/n_e, 1/n_e).
    codebooks = jax.random.uniform(kc, (L, n_e, D), dtype=jnp.float32,
                                   minval=-1.0 / n_e, maxval=1.0 / n_e)

    # Single-tile path (f32 scores -> bit-faithful argmin).
    xq, mean_loss, indices = residual_vq_forward(x, codebooks,
                                                 use_bf16_scores=False)
    jax.block_until_ready((xq, mean_loss, indices))
    xq_ref, loss_ref, idx_ref = residual_vq_reference(x, codebooks)
    np.testing.assert_allclose(np.asarray(xq), np.asarray(xq_ref), rtol=1e-5, atol=1e-5)
    np.testing.assert_allclose(np.asarray(mean_loss), np.asarray(loss_ref), rtol=1e-5, atol=1e-6)
    np.testing.assert_array_equal(np.asarray(indices), np.asarray(idx_ref))

    # Multi-tile path with a partial (masked) last tile, no wrapper padding:
    # N2=200 -> TN=128, grid of 2, last tile has 72 valid rows.
    N2 = 200
    x2 = jax.random.normal(kx2, (N2, D), dtype=jnp.float32)
    xq2, loss2, idx2 = residual_vq_forward(x2, codebooks, use_bf16_scores=False)
    jax.block_until_ready((xq2, loss2, idx2))
    xq2_ref, loss2_ref, idx2_ref = residual_vq_reference(x2, codebooks)
    np.testing.assert_allclose(np.asarray(xq2), np.asarray(xq2_ref), rtol=1e-5, atol=1e-5)
    np.testing.assert_allclose(np.asarray(loss2), np.asarray(loss2_ref), rtol=1e-5, atol=1e-6)
    np.testing.assert_array_equal(np.asarray(idx2), np.asarray(idx2_ref))

    # Larger medium case: N3=1000 -> TN=512, 2 tiles (both v7x TCs busy),
    # ragged 488-row last tile.
    N3 = 1000
    x3 = jax.random.normal(kx3, (N3, D), dtype=jnp.float32)
    xq3, loss3, idx3 = residual_vq_forward(x3, codebooks, use_bf16_scores=False)
    jax.block_until_ready((xq3, loss3, idx3))
    xq3_ref, loss3_ref, idx3_ref = residual_vq_reference(x3, codebooks)
    np.testing.assert_allclose(np.asarray(xq3), np.asarray(xq3_ref), rtol=1e-5, atol=1e-5)
    np.testing.assert_allclose(np.asarray(loss3), np.asarray(loss3_ref), rtol=1e-5, atol=1e-6)
    np.testing.assert_array_equal(np.asarray(idx3), np.asarray(idx3_ref))

    # Default bf16-scores path (full-rate MXU on v6e/v7x): values only loosely
    # checked since near-exact ties may pick a different (equally near) code.
    xq_bf, loss_bf, idx_bf = residual_vq_forward(x, codebooks)
    jax.block_until_ready((xq_bf, loss_bf, idx_bf))
    assert np.all(np.isfinite(np.asarray(xq_bf)))
    np.testing.assert_allclose(np.asarray(xq_bf), np.asarray(xq_ref), atol=0.1)
    np.testing.assert_allclose(np.asarray(loss_bf), np.asarray(loss_ref), rtol=5e-2)

    print("KERNEL_OK")
</pallas_src>

<mosaic_0001>
module attributes {stable_mosaic.version = 11 : i64} {
  func.func @_rvq_kernel(%arg0: i32, %arg1: memref<16x32xf32, #tpu.memory_space<vmem>>, %arg2: memref<3x32x128xf32, #tpu.memory_space<vmem>>, %arg3: memref<3x1x128xf32, #tpu.memory_space<vmem>>, %arg4: memref<16x32xf32, #tpu.memory_space<vmem>>, %arg5: memref<3x16xi32, #tpu.memory_space<vmem>>, %arg6: memref<1x8x128xf32, #tpu.memory_space<vmem>>) attributes {dimension_semantics = [#tpu.dimension_semantics<parallel>], iteration_bounds = array<i64: 1>, scalar_prefetch = 0 : i64, scratch_operands = 0 : i64, tpu.core_type = #tpu.core_type<tc>, window_params = [{transform_indices = @transform_0, window_bounds = array<i64: 16, 32>}, {pipeline_mode = #tpu.pipeline_mode<synchronous>, transform_indices = @transform_1, window_bounds = array<i64: 3, 32, 128>}, {pipeline_mode = #tpu.pipeline_mode<synchronous>, transform_indices = @transform_2, window_bounds = array<i64: 3, 1, 128>}, {transform_indices = @transform_3, window_bounds = array<i64: 16, 32>}, {transform_indices = @transform_4, window_bounds = array<i64: 3, 16>}, {transform_indices = @transform_5, window_bounds = array<i64: 1, 8, 128>}]} {
    %c0 = arith.constant 0 : index
    %c0_0 = arith.constant 0 : index
    %0 = vector.load %arg1[%c0, %c0_0] : memref<16x32xf32, #tpu.memory_space<vmem>>, vector<16x32xf32>
    %cst = arith.constant 0.000000e+00 : f32
    %1 = vector.broadcast %cst : f32 to vector<16x32xf32>
    %2 = tpu.iota {dimensions = array<i32: 1>} : vector<16x128xi32>
    %3 = tpu.iota {dimensions = array<i32: 1>} : vector<1x128xi32>
    %4 = arith.sitofp %3 : vector<1x128xi32> to vector<1x128xbf16>
    %c0_1 = arith.constant 0 : index
    %c0_2 = arith.constant 0 : index
    %c0_3 = arith.constant 0 : index
    %5 = vector.load %arg2[%c0_1, %c0_2, %c0_3] : memref<3x32x128xf32, #tpu.memory_space<vmem>>, vector<1x32x128xf32>
    %6 = vector.shape_cast %5 : vector<1x32x128xf32> to vector<32x128xf32>
    %cst_4 = arith.constant dense<0.000000e+00> : vector<16x128xf32>
    %7 = tpu.matmul %0, %6, %cst_4 {dimension_numbers = #tpu.dot_dimension_numbers<[1], [0], [0], [1], [0, 0, 1, 1], [], []>} : vector<16x32xf32>, vector<32x128xf32>, vector<16x128xf32> -> vector<16x128xf32>
    %c0_5 = arith.constant 0 : index
    %c0_6 = arith.constant 0 : index
    %c0_7 = arith.constant 0 : index
    %8 = vector.load %arg3[%c0_5, %c0_6, %c0_7] : memref<3x1x128xf32, #tpu.memory_space<vmem>>, vector<1x1x128xf32>
    %9 = vector.shape_cast %8 : vector<1x1x128xf32> to vector<1x128xf32>
    %10 = vector.broadcast %9 : vector<1x128xf32> to vector<16x128xf32>
    %11 = arith.subf %10, %7 : vector<16x128xf32>
    %cst_8 = arith.constant dense<0x7F800000> : vector<16xf32>
    %12 = vector.multi_reduction <minimumf>, %11, %cst_8 [1] : vector<16x128xf32> to vector<16xf32>
    %13 = vector.shape_cast %12 : vector<16xf32> to vector<16x1xf32>
    %14 = vector.broadcast %13 : vector<16x1xf32> to vector<16x128xf32>
    %15 = arith.cmpf oeq, %11, %14 : vector<16x128xf32>
    %c128_i32 = arith.constant 128 : i32
    %16 = vector.broadcast %c128_i32 : i32 to vector<16x128xi32>
    %17 = arith.select %15, %2, %16 : vector<16x128xi1>, vector<16x128xi32>
    %cst_9 = arith.constant dense<2147483647> : vector<16xi32>
    %18 = vector.multi_reduction <minsi>, %17, %cst_9 [1] : vector<16x128xi32> to vector<16xi32>
    %19 = vector.shape_cast %18 : vector<16xi32> to vector<16x1xi32>
    %20 = vector.broadcast %19 : vector<16x1xi32> to vector<16x128xi32>
    %21 = arith.cmpi eq, %2, %20 : vector<16x128xi32>
    %22 = arith.extui %21 : vector<16x128xi1> to vector<16x128xi32>
    %23 = arith.sitofp %22 : vector<16x128xi32> to vector<16x128xf32>
    %cst_10 = arith.constant dense<0.000000e+00> : vector<16x32xf32>
    %24 = tpu.matmul %23, %6, %cst_10 {dimension_numbers = #tpu.dot_dimension_numbers<[1], [1], [0], [0], [0, 0, 1, 0], [], []>} : vector<16x128xf32>, vector<32x128xf32>, vector<16x32xf32> -> vector<16x32xf32>
    %25 = arith.extui %21 : vector<16x128xi1> to vector<16x128xi32>
    %26 = arith.sitofp %25 : vector<16x128xi32> to vector<16x128xf32>
    %27 = arith.truncf %26 : vector<16x128xf32> to vector<16x128xbf16>
    %cst_11 = arith.constant dense<0.000000e+00> : vector<1x16xf32>
    %28 = tpu.matmul %4, %27, %cst_11 {dimension_numbers = #tpu.dot_dimension_numbers<[1], [1], [0], [0], [0, 0, 1, 0], [], []>} : vector<1x128xbf16>, vector<16x128xbf16>, vector<1x16xf32> -> vector<1x16xf32>
    %29 = arith.fptosi %28 : vector<1x16xf32> to vector<1x16xi32>
    %c0_12 = arith.constant 0 : index
    %c0_13 = arith.constant 0 : index
    %30 = vector.load %arg5[%c0_12, %c0_13] : memref<3x16xi32, #tpu.memory_space<vmem>>, vector<1x16xi32>
    tpu.vector_store %arg5[%c0_12, %c0_13], %29 {strides = array<i32>} : memref<3x16xi32, #tpu.memory_space<vmem>>, vector<1x16xi32>,
    %31 = arith.subf %24, %0 : vector<16x32xf32>
    %32 = arith.mulf %31, %31 : vector<16x32xf32>
    %33 = vector.shape_cast %32 : vector<16x32xf32> to vector<1x16x32xf32>
    %cst_14 = arith.constant dense<0.000000e+00> : vector<1xf32>
    %34 = vector.multi_reduction <add>, %33, %cst_14 [1, 2] : vector<1x16x32xf32> to vector<1xf32>
    %35 = vector.shape_cast %34 : vector<1xf32> to vector<1x1x1xf32>
    %36 = vector.extract %35[0, 0, 0] : f32 from vector<1x1x1xf32>
    %cst_15 = arith.constant 0.000000e+00 : f32
    %37 = arith.addf %cst_15, %36 : f32
    %38 = arith.addf %1, %24 : vector<16x32xf32>
    %39 = arith.subf %0, %24 : vector<16x32xf32>
    %c1 = arith.constant 1 : index
    %c0_16 = arith.constant 0 : index
    %c0_17 = arith.constant 0 : index
    %40 = vector.load %arg2[%c1, %c0_16, %c0_17] : memref<3x32x128xf32, #tpu.memory_space<vmem>>, vector<1x32x128xf32>
    %41 = vector.shape_cast %40 : vector<1x32x128xf32> to vector<32x128xf32>
    %cst_18 = arith.constant dense<0.000000e+00> : vector<16x128xf32>
    %42 = tpu.matmul %39, %41, %cst_18 {dimension_numbers = #tpu.dot_dimension_numbers<[1], [0], [0], [1], [0, 0, 1, 1], [], []>} : vector<16x32xf32>, vector<32x128xf32>, vector<16x128xf32> -> vector<16x128xf32>
    %c1_19 = arith.constant 1 : index
    %c0_20 = arith.constant 0 : index
    %c0_21 = arith.constant 0 : index
    %43 = vector.load %arg3[%c1_19, %c0_20, %c0_21] : memref<3x1x128xf32, #tpu.memory_space<vmem>>, vector<1x1x128xf32>
    %44 = vector.shape_cast %43 : vector<1x1x128xf32> to vector<1x128xf32>
    %45 = vector.broadcast %44 : vector<1x128xf32> to vector<16x128xf32>
    %46 = arith.subf %45, %42 : vector<16x128xf32>
    %cst_22 = arith.constant dense<0x7F800000> : vector<16xf32>
    %47 = vector.multi_reduction <minimumf>, %46, %cst_22 [1] : vector<16x128xf32> to vector<16xf32>
    %48 = vector.shape_cast %47 : vector<16xf32> to vector<16x1xf32>
    %49 = vector.broadcast %48 : vector<16x1xf32> to vector<16x128xf32>
    %50 = arith.cmpf oeq, %46, %49 : vector<16x128xf32>
    %c128_i32_23 = arith.constant 128 : i32
    %51 = vector.broadcast %c128_i32_23 : i32 to vector<16x128xi32>
    %52 = arith.select %50, %2, %51 : vector<16x128xi1>, vector<16x128xi32>
    %cst_24 = arith.constant dense<2147483647> : vector<16xi32>
    %53 = vector.multi_reduction <minsi>, %52, %cst_24 [1] : vector<16x128xi32> to vector<16xi32>
    %54 = vector.shape_cast %53 : vector<16xi32> to vector<16x1xi32>
    %55 = vector.broadcast %54 : vector<16x1xi32> to vector<16x128xi32>
    %56 = arith.cmpi eq, %2, %55 : vector<16x128xi32>
    %57 = arith.extui %56 : vector<16x128xi1> to vector<16x128xi32>
    %58 = arith.sitofp %57 : vector<16x128xi32> to vector<16x128xf32>
    %cst_25 = arith.constant dense<0.000000e+00> : vector<16x32xf32>
    %59 = tpu.matmul %58, %41, %cst_25 {dimension_numbers = #tpu.dot_dimension_numbers<[1], [1], [0], [0], [0, 0, 1, 0], [], []>} : vector<16x128xf32>, vector<32x128xf32>, vector<16x32xf32> -> vector<16x32xf32>
    %60 = arith.extui %56 : vector<16x128xi1> to vector<16x128xi32>
    %61 = arith.sitofp %60 : vector<16x128xi32> to vector<16x128xf32>
    %62 = arith.truncf %61 : vector<16x128xf32> to vector<16x128xbf16>
    %cst_26 = arith.constant dense<0.000000e+00> : vector<1x16xf32>
    %63 = tpu.matmul %4, %62, %cst_26 {dimension_numbers = #tpu.dot_dimension_numbers<[1], [1], [0], [0], [0, 0, 1, 0], [], []>} : vector<1x128xbf16>, vector<16x128xbf16>, vector<1x16xf32> -> vector<1x16xf32>
    %64 = arith.fptosi %63 : vector<1x16xf32> to vector<1x16xi32>
    %c1_27 = arith.constant 1 : index
    %c0_28 = arith.constant 0 : index
    %65 = vector.load %arg5[%c1_27, %c0_28] : memref<3x16xi32, #tpu.memory_space<vmem>>, vector<1x16xi32>
    tpu.vector_store %arg5[%c1_27, %c0_28], %64 {strides = array<i32>} : memref<3x16xi32, #tpu.memory_space<vmem>>, vector<1x16xi32>,
    %66 = arith.subf %59, %39 : vector<16x32xf32>
    %67 = arith.mulf %66, %66 : vector<16x32xf32>
    %68 = vector.shape_cast %67 : vector<16x32xf32> to vector<1x16x32xf32>
    %cst_29 = arith.constant dense<0.000000e+00> : vector<1xf32>
    %69 = vector.multi_reduction <add>, %68, %cst_29 [1, 2] : vector<1x16x32xf32> to vector<1xf32>
    %70 = vector.shape_cast %69 : vector<1xf32> to vector<1x1x1xf32>
    %71 = vector.extract %70[0, 0, 0] : f32 from vector<1x1x1xf32>
    %72 = arith.addf %37, %71 : f32
    %73 = arith.addf %38, %59 : vector<16x32xf32>
    %74 = arith.subf %39, %59 : vector<16x32xf32>
    %c2 = arith.constant 2 : index
    %c0_30 = arith.constant 0 : index
    %c0_31 = arith.constant 0 : index
    %75 = vector.load %arg2[%c2, %c0_30, %c0_31] : memref<3x32x128xf32, #tpu.memory_space<vmem>>, vector<1x32x128xf32>
    %76 = vector.shape_cast %75 : vector<1x32x128xf32> to vector<32x128xf32>
    %cst_32 = arith.constant dense<0.000000e+00> : vector<16x128xf32>
    %77 = tpu.matmul %74, %76, %cst_32 {dimension_numbers = #tpu.dot_dimension_numbers<[1], [0], [0], [1], [0, 0, 1, 1], [], []>} : vector<16x32xf32>, vector<32x128xf32>, vector<16x128xf32> -> vector<16x128xf32>
    %c2_33 = arith.constant 2 : index
    %c0_34 = arith.constant 0 : index
    %c0_35 = arith.constant 0 : index
    %78 = vector.load %arg3[%c2_33, %c0_34, %c0_35] : memref<3x1x128xf32, #tpu.memory_space<vmem>>, vector<1x1x128xf32>
    %79 = vector.shape_cast %78 : vector<1x1x128xf32> to vector<1x128xf32>
    %80 = vector.broadcast %79 : vector<1x128xf32> to vector<16x128xf32>
    %81 = arith.subf %80, %77 : vector<16x128xf32>
    %cst_36 = arith.constant dense<0x7F800000> : vector<16xf32>
    %82 = vector.multi_reduction <minimumf>, %81, %cst_36 [1] : vector<16x128xf32> to vector<16xf32>
    %83 = vector.shape_cast %82 : vector<16xf32> to vector<16x1xf32>
    %84 = vector.broadcast %83 : vector<16x1xf32> to vector<16x128xf32>
    %85 = arith.cmpf oeq, %81, %84 : vector<16x128xf32>
    %c128_i32_37 = arith.constant 128 : i32
    %86 = vector.broadcast %c128_i32_37 : i32 to vector<16x128xi32>
    %87 = arith.select %85, %2, %86 : vector<16x128xi1>, vector<16x128xi32>
    %cst_38 = arith.constant dense<2147483647> : vector<16xi32>
    %88 = vector.multi_reduction <minsi>, %87, %cst_38 [1] : vector<16x128xi32> to vector<16xi32>
    %89 = vector.shape_cast %88 : vector<16xi32> to vector<16x1xi32>
    %90 = vector.broadcast %89 : vector<16x1xi32> to vector<16x128xi32>
    %91 = arith.cmpi eq, %2, %90 : vector<16x128xi32>
    %92 = arith.extui %91 : vector<16x128xi1> to vector<16x128xi32>
    %93 = arith.sitofp %92 : vector<16x128xi32> to vector<16x128xf32>
    %cst_39 = arith.constant dense<0.000000e+00> : vector<16x32xf32>
    %94 = tpu.matmul %93, %76, %cst_39 {dimension_numbers = #tpu.dot_dimension_numbers<[1], [1], [0], [0], [0, 0, 1, 0], [], []>} : vector<16x128xf32>, vector<32x128xf32>, vector<16x32xf32> -> vector<16x32xf32>
    %95 = arith.extui %91 : vector<16x128xi1> to vector<16x128xi32>
    %96 = arith.sitofp %95 : vector<16x128xi32> to vector<16x128xf32>
    %97 = arith.truncf %96 : vector<16x128xf32> to vector<16x128xbf16>
    %cst_40 = arith.constant dense<0.000000e+00> : vector<1x16xf32>
    %98 = tpu.matmul %4, %97, %cst_40 {dimension_numbers = #tpu.dot_dimension_numbers<[1], [1], [0], [0], [0, 0, 1, 0], [], []>} : vector<1x128xbf16>, vector<16x128xbf16>, vector<1x16xf32> -> vector<1x16xf32>
    %99 = arith.fptosi %98 : vector<1x16xf32> to vector<1x16xi32>
    %c2_41 = arith.constant 2 : index
    %c0_42 = arith.constant 0 : index
    %100 = vector.load %arg5[%c2_41, %c0_42] : memref<3x16xi32, #tpu.memory_space<vmem>>, vector<1x16xi32>
    tpu.vector_store %arg5[%c2_41, %c0_42], %99 {strides = array<i32>} : memref<3x16xi32, #tpu.memory_space<vmem>>, vector<1x16xi32>,
    %101 = arith.subf %94, %74 : vector<16x32xf32>
    %102 = arith.mulf %101, %101 : vector<16x32xf32>
    %103 = vector.shape_cast %102 : vector<16x32xf32> to vector<1x16x32xf32>
    %cst_43 = arith.constant dense<0.000000e+00> : vector<1xf32>
    %104 = vector.multi_reduction <add>, %103, %cst_43 [1, 2] : vector<1x16x32xf32> to vector<1xf32>
    %105 = vector.shape_cast %104 : vector<1xf32> to vector<1x1x1xf32>
    %106 = vector.extract %105[0, 0, 0] : f32 from vector<1x1x1xf32>
    %107 = arith.addf %72, %106 : f32
    %108 = arith.addf %73, %94 : vector<16x32xf32>
    %c0_44 = arith.constant 0 : index
    %c0_45 = arith.constant 0 : index
    %109 = vector.load %arg4[%c0_44, %c0_45] : memref<16x32xf32, #tpu.memory_space<vmem>>, vector<16x32xf32>
    tpu.vector_store %arg4[%c0_44, %c0_45], %108 {strides = array<i32>} : memref<16x32xf32, #tpu.memory_space<vmem>>, vector<16x32xf32>,
    %cst_46 = arith.constant 0.000000e+00 : f32
    %110 = vector.broadcast %cst_46 : f32 to vector<1x8x128xf32>
    %111 = vector.broadcast %107 : f32 to vector<1x8x128xf32>
    %112 = arith.addf %110, %111 : vector<1x8x128xf32>
    %c0_47 = arith.constant 0 : index
    %c0_48 = arith.constant 0 : index
    %c0_49 = arith.constant 0 : index
    %113 = vector.load %arg6[%c0_47, %c0_48, %c0_49] : memref<1x8x128xf32, #tpu.memory_space<vmem>>, vector<1x8x128xf32>
    tpu.vector_store %arg6[%c0_47, %c0_48, %c0_49], %112 {strides = array<i32>} : memref<1x8x128xf32, #tpu.memory_space<vmem>>, vector<1x8x128xf32>,
    return
  }
  func.func @transform_0(%arg0: i32) -> (i32, i32) {
    %c0_i32 = arith.constant 0 : i32
    %c0_i32_0 = arith.constant 0 : i32
    return %arg0, %c0_i32 : i32, i32
  }
  func.func @transform_1(%arg0: i32) -> (i32, i32, i32) {
    %c0_i32 = arith.constant 0 : i32
    %c0_i32_0 = arith.constant 0 : i32
    %c0_i32_1 = arith.constant 0 : i32
    %c0_i32_2 = arith.constant 0 : i32
    return %c0_i32, %c0_i32_0, %c0_i32_1 : i32, i32, i32
  }
  func.func @transform_2(%arg0: i32) -> (i32, i32, i32) {
    %c0_i32 = arith.constant 0 : i32
    %c0_i32_0 = arith.constant 0 : i32
    %c0_i32_1 = arith.constant 0 : i32
    %c0_i32_2 = arith.constant 0 : i32
    return %c0_i32, %c0_i32_0, %c0_i32_1 : i32, i32, i32
  }
  func.func @transform_3(%arg0: i32) -> (i32, i32) {
    %c0_i32 = arith.constant 0 : i32
    %c0_i32_0 = arith.constant 0 : i32
    return %arg0, %c0_i32 : i32, i32
  }
  func.func @transform_4(%arg0: i32) -> (i32, i32) {
    %c0_i32 = arith.constant 0 : i32
    %c0_i32_0 = arith.constant 0 : i32
    return %c0_i32, %arg0 : i32, i32
  }
  func.func @transform_5(%arg0: i32) -> (i32, i32, i32) {
    %c0_i32 = arith.constant 0 : i32
    %c0_i32_0 = arith.constant 0 : i32
    %c0_i32_1 = arith.constant 0 : i32
    return %arg0, %c0_i32, %c0_i32_0 : i32, i32, i32
  }
}

</mosaic_0001>

<bundles_post_ra>
// kernel: tpu_custom_call.1
= control target key start
LH: loop header
LB: loop body
LE: loop exit
PB: predicated region body
PF: predicated region fallthrough
CT: control target
= control target key end

     0   :  { %11 = vsyncpa [#allocation3], 0  ;;  %s1396_s0 = inlined_call_operand.hbm [shape: f32[16,32], index: 0, kind: input, shape index: {}]   ;;  %s1397_s1 = inlined_call_operand.hbm [shape: f32[3,32,128], index: 1, kind: input, shape index: {}]   ;;  %s1398_s2 = inlined_call_operand.vmem [shape: f32[3,1,128], index: 2, kind: input, shape index: {}]   ;;  %s1399_s3 = inlined_call_operand.hbm [shape: f32[16,32], index: 3, kind: output, shape index: {0}]   ;;  %s1400_s4 = inlined_call_operand.hbm [shape: s32[3,16], index: 4, kind: output, shape index: {1}]   ;;  %s1401_s5 = inlined_call_operand.hbm [shape: f32[1,8,128], index: 5, kind: output, shape index: {2}]  }
   0x1   :  { %12 = vsyncpa [#allocation6], 0 }
   0x2   :  { %13 = vsyncpa [#allocation4], 0 }
   0x3   :  { %14 = vsyncpa [#allocation9], 0  ;;  %s1219_s18 = smov [#allocation2]  }
   0x4   :  { %s20_s19 = sshll.u32 %s1219_s18, 4  ;;  %s21_s19 = int_to_ptr.vmem [resolvable:$true] %s20_s19 }
   0x5   :  { %s1119_s20 = scalar_lea.vmem %s21_s19, 256  ;;  %p1124_p1 = scmp.lt.s32.totalorder %s21_s19, %s21_s19 }
   0x6   :  { %p1120_p0 = scmp.ne.s32.totalorder %s21_s19, %s1119_s20  ;;  %p1125_p2 = scmp.lt.s32.totalorder %s1119_s20, %s1119_s20 }
   0x8   :  { %p1126_p3 = por %p1125_p2, %p1124_p1 }
   0xa   :  { %p1127_p4 = pnand %p1126_p3, %p1120_p0 }
   0xc   :  { %1130 = shalt.err (!%p1127_p4)
}
   0xd   :  { %s1220_s21 = smov 128   ;;  %s1221_s22 = smov 8  }
   0xe   :  { %26 = dma.hbm_to_vmem [thread:$0]  %s1396_s0, 256, %s21_s19, [#allocation3], %s1220_s21, %s1220_s21, %s1221_s22  }
   0xf   :  { %s1222_s25 = smov [#allocation5]  }
  0x10   :  { %s32_s26 = sshll.u32 %s1222_s25, 4  ;;  %s33_s26 = int_to_ptr.vmem [resolvable:$true] %s32_s26 }
  0x11   :  { %s1139_s27 = scalar_lea.vmem %s33_s26, 1536  ;;  %p1144_p6 = scmp.lt.s32.totalorder %s33_s26, %s33_s26 }
  0x12   :  { %p1140_p5 = scmp.ne.s32.totalorder %s33_s26, %s1139_s27  ;;  %p1145_p7 = scmp.lt.s32.totalorder %s1139_s27, %s1139_s27 }
  0x14   :  { %p1146_p8 = por %p1145_p7, %p1144_p6 }
  0x16   :  { %p1147_p9 = pnand %p1146_p8, %p1140_p5 }
  0x18   :  { %1150 = shalt.err (!%p1147_p9)
}
  0x19   :  { %38 = dma.hbm_to_vmem [thread:$0]  %s1397_s1, 1536, %s33_s26, [#allocation6], %s1220_s21, %s1220_s21, %s1221_s22  }
  0x1a   :  { %1211 = dma.done.wait [#allocation3], 256  }
  0x1b   :  { %1212 = vsyncadd [#allocation3], 4294967040 }
  0x1c   :  { %1213 = dma.done.wait [#allocation6], 1536  }
  0x1d   :  { %1214 = vsyncadd [#allocation6], 4294965760  ;;  %vm58_vm0 = vcmask 261120   ;;  %v57_v0 = vld [vmem:[#allocation5 + $0x18] sm:$0xff]  ;;  %v56_v1 = vld [vmem:[#allocation5 + $0x10] sm:$0xff]  ;;  %v50_v11 = vlaneseq  ;;  %v1223_v29 = vmov 0.0  }
  0x1e   :  { %1004 = vmatprep.subr.mxu0 %v57_v0  ;;  %v1272_v2 = vld [vmem:[#allocation2] sm:$0xff]  ;;  %1015 = vmatprep.subr.mxu1 %v57_v0  ;;  %v55_v3 = vld [vmem:[#allocation5 + $0x8] sm:$0xff]  ;;  %v54_v4 = vld [vmem:[#allocation5] sm:$0xff]  ;;  %vm1224_vm5 = vmmov 0   ;;  %v1225_v40 = vmov 1.0   ;;  %vm308_vm9 = vcmask 122880  }
  0x1f   :  { %1005 = vmatpush3.msra.mxu0 %v57_v0  ;;  %1012 = vmatprep.mubr.msk.f32.mxu0 %vm58_vm0, %v1272_v2  ;;  %v1276_v5 = vld [vmem:[#allocation2 + $0x8] sm:$0xff]  ;;  %v935_v7 = vld [vmem:[%s1398_s2] ss:$0 sm:$0xff]  ;;  %v1283_v12 = vand.u32 127, %v50_v11  ;;  %v1226_v43 = vmov 1.0|1.0  }
  0x20   :  { %1006 = vmatprep.subr.mxu0 %v56_v1  ;;  %1016 = vmatpush3.xpose.msra.mxu1 %v57_v0  ;;  %v335_v30 = vld [vmem:[#allocation5 + $0x38] sm:$0xff]  ;;  %v334_v44 = vld [vmem:[#allocation5 + $0x30] sm:$0xff]  ;;  %v333_v46 = vld [vmem:[#allocation5 + $0x28] sm:$0xff]  ;;  %s1228_s10 = smov [#allocation7]  }
  0x21   :  { %1007 = vmatpush3.msra.mxu0 %v56_v1  ;;  %1017 = vmatprep.subr.mxu1 %v56_v1  ;;  %v52_v42 = vcvt.s32.f32 %v1283_v12  ;;  %v332_v47 = vld [vmem:[#allocation5 + $0x20] sm:$0xff]  ;;  %v945_v58 = vld [vmem:[%s1398_s2 + $0x1] ss:$0 sm:$0xff]  ;;  %s893_s11 = sshll.u32 %s1228_s10, 4  ;;  %s894_s11 = int_to_ptr.vmem [resolvable:$true] %s893_s11 }
  0x22   :  { %1008 = vmatprep.subr.mxu0 %v55_v3 }
  0x23   :  { %1009 = vmatpush3.msra.mxu0 %v55_v3  ;;  %v1296_v45 = vpack.c.bf16 %v52_v42, %v52_v42 }
  0x24   :  { %1010 = vmatprep.subr.mxu0 %v54_v4  ;;  %1018 = vmatpush3.xpose.msra.mxu1 %v56_v1 }
  0x25   :  { %1011 = vmatpush3.msra.mxu0 %v54_v4  ;;  %1019 = vmatprep.subr.mxu1 %v55_v3 }
  0x26   :  { %1013 = vmatmul.mubr.msk.f32.vlgmr.msra.gmra.mxu0 %vm58_vm0, %v1276_v5  ;;  %1026 = vmatprep.subr.bf16.mxu0 %v1223_v29 }
  0x27   :  { %1028 = vmatprep.mubr.msk.bf16.mxu0 %vm1224_vm5, %v1223_v29 }
  0x28   :  { %1020 = vmatpush3.xpose.msra.mxu1 %v55_v3 }
  0x29   :  { %1021 = vmatprep.subr.mxu1 %v54_v4 }
  0x2c   :  { %1022 = vmatpush3.xpose.msra.mxu1 %v54_v4 }
  0x2d   :  { %1043 = vmatprep.subr.mxu1 %v335_v30 }
  0xe6   :  { %v1014_v6 = vpop.f32.mrf.mxu0 }
  0xe7   :  { %v148_v10 = vsub.f32 %v935_v7, %v1014_v6 }
  0xe8   :  { %v131_v8 = vpop.f32.mrf.mxu0 }
  0xe9   :  { %v147_v9 = vsub.f32 %v935_v7, %v131_v8 }
  0xeb   :  { %149 = vmin.xlane.f32.xlu0 %v147_v9 }
  0xef   :  { %151 = vmin.xlane.f32.xlu0 %v148_v10 }
 0x174   :  { %v150_v13 = vpop.xlane.xlu0 %149 }
 0x175   :  { %vm153_vm1 = vcmp.eq.f32.partialorder %v147_v9, %v150_v13 }
 0x176   :  { %v155_v14 = vsel %vm153_vm1, %v1283_v12, 128 }
 0x177   :  { %v158_v15 = vshra.s32 %v155_v14, 16  ;;  %v157_v21 = vand.u32 65535, %v155_v14 }
 0x178   :  { %v152_v16 = vpop.xlane.xlu0 %151 }
 0x179   :  { %vm154_vm2 = vcmp.eq.f32.partialorder %v148_v10, %v152_v16  ;;  %v160_v17 = vcvt.s32.f32 %v158_v15  ;;  %v159_v24 = vcvt.s32.f32 %v157_v21 }
 0x17a   :  { %v156_v18 = vsel %vm154_vm2, %v1283_v12, 128 }
 0x17b   :  { %161 = vmin.xlane.f32.xlu1 %v160_v17  ;;  %v172_v19 = vshra.s32 %v156_v18, 16  ;;  %v171_v22 = vand.u32 65535, %v156_v18  ;;  %v612_v18 = vld [vmem:[#allocation5 + $0x58] sm:$0xff] }
 0x17d   :  { %v174_v20 = vcvt.s32.f32 %v172_v19  ;;  %v173_v27 = vcvt.s32.f32 %v171_v22 }
 0x17f   :  { %175 = vmin.xlane.f32.xlu1 %v174_v20 }
 0x204   :  { %v162_v23 = vpop.xlane.xlu1 %161 }
 0x205   :  { %vm163_vm3 = vcmp.eq.f32.partialorder %v160_v17, %v162_v23  ;;  %v168_v31 = vcvt.f32.s32 %v162_v23 }
 0x206   :  { %v164_v25 = vsel %vm163_vm3, %v159_v24, inf }
 0x207   :  { %165 = vmin.xlane.f32.xlu0 %v164_v25  ;;  %v169_v33 = vshll.u32 %v168_v31, 16  ;;  %v610_v31 = vld [vmem:[#allocation5 + $0x48] sm:$0xff] }
 0x208   :  { %v176_v26 = vpop.xlane.xlu1 %175 }
 0x209   :  { %vm177_vm4 = vcmp.eq.f32.partialorder %v174_v20, %v176_v26  ;;  %v182_v34 = vcvt.f32.s32 %v176_v26 }
 0x20a   :  { %v178_v28 = vsel %vm177_vm4, %v173_v27, inf }
 0x20b   :  { %179 = vmin.xlane.f32.xlu1 %v178_v28  ;;  %v183_v38 = vshll.u32 %v182_v34, 16 }
 0x290   :  { %v166_v32 = vpop.xlane.xlu0 %165 }
 0x291   :  { %v167_v35 = vcvt.f32.s32 %v166_v32  ;;  %v609_v32 = vld [vmem:[#allocation5 + $0x40] sm:$0xff] }
 0x293   :  { %v170_v36 = vadd.s32 %v169_v33, %v167_v35 }
 0x294   :  { %v180_v37 = vpop.xlane.xlu1 %179 }
 0x295   :  { %v181_v39 = vcvt.f32.s32 %v180_v37  ;;  %vm185_vm6 = vcmp.eq.s32.totalorder %v1283_v12, %v170_v36 }
 0x296   :  { %1023 = vmatprep.mubr.msk.f32.mxu1 %vm185_vm6, %v1225_v40 }
 0x297   :  { %v184_v41 = vadd.s32 %v183_v38, %v181_v39 }
 0x299   :  { %vm186_vm7 = vcmp.eq.s32.totalorder %v1283_v12, %v184_v41 }
 0x29a   :  { %vm940_vm8 = vmpackc.low %vm186_vm7, %vm185_vm6  ;;  %1024 = vmatmul.mubr.msk.f32.vlgmr.msra.gmra.mxu1 %vm186_vm7, %v1225_v40 }
 0x29b   :  { %1027 = vmatpush3.bf16.xpose.msk.msra.mxu0 %vm940_vm8, %v1226_v43  ;;  %1044 = vmatpush3.xpose.msra.mxu1 %v335_v30 }
 0x29c   :  { %1032 = vmatprep.subr.mxu0 %v335_v30  ;;  %1045 = vmatprep.subr.mxu1 %v334_v44 }
 0x29f   :  { %1046 = vmatpush3.xpose.msra.mxu1 %v334_v44 }
 0x2a0   :  { %1047 = vmatprep.subr.mxu1 %v333_v46 }
 0x2a2   :  { %1029 = vmatmul.mubr.bf16.vlgmr.msra.gmra.mxu0 %v1296_v45 }
 0x2a3   :  { %1033 = vmatpush3.msra.mxu0 %v335_v30  ;;  %1048 = vmatpush3.xpose.msra.mxu1 %v333_v46  ;;  %v611_v30 = vld [vmem:[#allocation5 + $0x50] sm:$0xff] }
 0x2a4   :  { %1034 = vmatprep.subr.mxu0 %v334_v44  ;;  %1049 = vmatprep.subr.mxu1 %v332_v47 }
 0x2a5   :  { %1035 = vmatpush3.msra.mxu0 %v334_v44 }
 0x2a6   :  { %1036 = vmatprep.subr.mxu0 %v333_v46 }
 0x2a7   :  { %1037 = vmatpush3.msra.mxu0 %v333_v46  ;;  %1050 = vmatpush3.xpose.msra.mxu1 %v332_v47  ;;  %v955_v46 = vld [vmem:[%s1398_s2 + $0x2] ss:$0 sm:$0xff]  ;;  %s1227_s2 = smov [#allocation8]  }
 0x2a8   :  { %1038 = vmatprep.subr.mxu0 %v332_v47  ;;  %1071 = vmatprep.subr.mxu1 %v612_v18  ;;  %s906_s9 = sshll.u32 %s1227_s2, 4  ;;  %s907_s9 = int_to_ptr.vmem [resolvable:$true] %s906_s9 }
 0x2a9   :  { %1039 = vmatpush3.msra.mxu0 %v332_v47  ;;  %s1151_s12 = scalar_lea.vmem %s907_s9, 64  ;;  %p1156_p11 = scmp.lt.s32.totalorder %s907_s9, %s907_s9 }
 0x2aa   :  { %1054 = vmatprep.subr.bf16.mxu0 %v1223_v29  ;;  %p1152_p10 = scmp.ne.s32.totalorder %s907_s9, %s1151_s12  ;;  %p1157_p12 = scmp.lt.s32.totalorder %s1151_s12, %s1151_s12 }
 0x2ac   :  { %p1158_p13 = por %p1157_p12, %p1156_p11 }
 0x2ae   :  { %p1159_p0 = pnand %p1158_p13, %p1152_p10 }
 0x35a   :  { %v1300_v48 = vpop.f32.mrf.mxu1 }
 0x35b   :  { %v1310_v51 = vsub.f32 %v1276_v5, %v1300_v48 }
 0x35c   :  { %v1302_v49 = vpop.f32.mrf.mxu1 }
 0x35d   :  { %v1306_v50 = vsub.f32 %v1272_v2, %v1302_v49 }
 0x35f   :  { %1040 = vmatprep.mubr.msk.f32.mxu0 %vm58_vm0, %v1306_v50 }
 0x360   :  { %1041 = vmatmul.mubr.msk.f32.vlgmr.msra.gmra.mxu0 %vm58_vm0, %v1310_v51 }
 0x361   :  { %1056 = vmatprep.mubr.msk.bf16.mxu0 %vm1224_vm5, %v1223_v29 }
 0x362   :  { %v301_v52 = vpop.f32.mrf.mxu0 }
 0x363   :  { %v1088_v53 = vtrunc.f32 %v301_v52 }
 0x364   :  { %v1030_v54 = vpop.f32.mrf.mxu0 }
 0x365   :  { %v1089_v55 = vcvt.f32.s32 %v1088_v53 }
 0x366   :  { %v304_v56 = vpop.f32.mrf.mxu0 }
 0x367   :  { %309 = vst.msk [vmem:[#allocation8] sm:$0x1] %vm308_vm9, %v1089_v55 }
 0x368   :  { %v1031_v57 = vpop.f32.mrf.mxu0 }
 0x420   :  { %v1042_v59 = vpop.f32.mrf.mxu0 }
 0x421   :  { %v426_v60 = vsub.f32 %v945_v58, %v1042_v59 }
 0x422   :  { %v408_v61 = vpop.f32.mrf.mxu0 }
 0x423   :  { %v425_v62 = vsub.f32 %v945_v58, %v408_v61  ;;  %429 = vmin.xlane.f32.xlu1 %v426_v60 }
 0x425   :  { %427 = vmin.xlane.f32.xlu0 %v425_v62 }
 0x4ac   :  { %v430_v63 = vpop.xlane.xlu1 %429 }
 0x4ad   :  { %vm432_vm10 = vcmp.eq.f32.partialorder %v426_v60, %v430_v63  ;;  %v310_v63 = vsub.f32 %v1302_v49, %v1272_v2 }
 0x4ae   :  { %v434_v0 = vsel %vm432_vm10, %v1283_v12, 128  ;;  %v428_v1 = vpop.xlane.xlu0 %427 }
 0x4af   :  { %vm431_vm11 = vcmp.eq.f32.partialorder %v425_v62, %v428_v1  ;;  %v450_v3 = vshra.s32 %v434_v0, 16  ;;  %v449_v9 = vand.u32 65535, %v434_v0 }
 0x4b0   :  { %v433_v4 = vsel %vm431_vm11, %v1283_v12, 128 }
 0x4b1   :  { %v452_v6 = vcvt.s32.f32 %v450_v3  ;;  %v436_v7 = vshra.s32 %v433_v4, 16  ;;  %v435_v10 = vand.u32 65535, %v433_v4  ;;  %v451_v13 = vcvt.s32.f32 %v449_v9 }
 0x4b2   :  { %v311_v3 = vsub.f32 %v1300_v48, %v1276_v5 }
 0x4b3   :  { %453 = vmin.xlane.f32.xlu1 %v452_v6  ;;  %v438_v8 = vcvt.s32.f32 %v436_v7  ;;  %v437_v16 = vcvt.s32.f32 %v435_v10  ;;  %v312_v7 = vmul.f32 %v310_v63, %v310_v63 }
 0x4b5   :  { %439 = vmin.xlane.f32.xlu0 %v438_v8  ;;  %v314_v5 = vsel %vm58_vm0, %v312_v7, 0.0 }
 0x53c   :  { %v454_v11 = vpop.xlane.xlu1 %453 }
 0x53d   :  { %vm455_vm12 = vcmp.eq.f32.partialorder %v452_v6, %v454_v11  ;;  %v460_v19 = vcvt.f32.s32 %v454_v11  ;;  %v313_v11 = vmul.f32 %v311_v3, %v311_v3 }
 0x53e   :  { %v440_v14 = vpop.xlane.xlu0 %439  ;;  %v456_v15 = vsel %vm455_vm12, %v451_v13, inf }
 0x53f   :  { %457 = vmin.xlane.f32.xlu1 %v456_v15  ;;  %vm441_vm13 = vcmp.eq.f32.partialorder %v438_v8, %v440_v14  ;;  %v446_v20 = vcvt.f32.s32 %v440_v14  ;;  %v461_v22 = vshll.u32 %v460_v19, 16 }
 0x540   :  { %v442_v17 = vsel %vm441_vm13, %v437_v16, inf }
 0x541   :  { %443 = vmin.xlane.f32.xlu0 %v442_v17  ;;  %v447_v25 = vshll.u32 %v446_v20, 16  ;;  %v315_v17 = vsel %vm58_vm0, %v313_v11, 0.0 }
 0x5c8   :  { %v458_v21 = vpop.xlane.xlu1 %457 }
 0x5c9   :  { %v459_v23 = vcvt.f32.s32 %v458_v21 }
 0x5ca   :  { %v444_v24 = vpop.xlane.xlu0 %443 }
 0x5cb   :  { %v462_v26 = vadd.s32 %v461_v22, %v459_v23  ;;  %v445_v27 = vcvt.f32.s32 %v444_v24 }
 0x5cd   :  { %v448_v28 = vadd.s32 %v447_v25, %v445_v27  ;;  %vm464_vm14 = vcmp.eq.s32.totalorder %v1283_v12, %v462_v26 }
 0x5cf   :  { %vm463_vm15 = vcmp.eq.s32.totalorder %v1283_v12, %v448_v28 }
 0x5d0   :  { %1051 = vmatprep.mubr.msk.f32.mxu1 %vm463_vm15, %v1225_v40  ;;  %vm950_vm1 = vmpackc.low %vm464_vm14, %vm463_vm15 }
 0x5d1   :  { %1052 = vmatmul.mubr.msk.f32.vlgmr.msra.gmra.mxu1 %vm464_vm14, %v1225_v40  ;;  %1055 = vmatpush3.bf16.xpose.msk.msra.mxu0 %vm950_vm1, %v1226_v43 }
 0x5d2   :  { %1060 = vmatprep.subr.mxu0 %v612_v18  ;;  %1072 = vmatpush3.xpose.msra.mxu1 %v612_v18 }
 0x5d3   :  { %1073 = vmatprep.subr.mxu1 %v611_v30 }
 0x5d6   :  { %1074 = vmatpush3.xpose.msra.mxu1 %v611_v30 }
 0x5d7   :  { %1075 = vmatprep.subr.mxu1 %v610_v31 }
 0x5d8   :  { %1057 = vmatmul.mubr.bf16.vlgmr.msra.gmra.mxu0 %v1296_v45 }
 0x5d9   :  { %1061 = vmatpush3.msra.mxu0 %v612_v18  ;;  %v316_v18 = vadd.f32 %v315_v17, %v314_v5 }
 0x5da   :  { %1062 = vmatprep.subr.mxu0 %v611_v30  ;;  %1076 = vmatpush3.xpose.msra.mxu1 %v610_v31 }
 0x5db   :  { %1063 = vmatpush3.msra.mxu0 %v611_v30  ;;  %1077 = vmatprep.subr.mxu1 %v609_v32 }
 0x5dc   :  { %1064 = vmatprep.subr.mxu0 %v610_v31 }
 0x5dd   :  { %1065 = vmatpush3.msra.mxu0 %v610_v31 }
 0x5de   :  { %1066 = vmatprep.subr.mxu0 %v609_v32  ;;  %1078 = vmatpush3.xpose.msra.mxu1 %v609_v32 }
 0x5df   :  { %1067 = vmatpush3.msra.mxu0 %v609_v32 }
 0x5e0   :  { %1082 = vmatprep.subr.bf16.mxu0 %v1223_v29 }
 0x691   :  { %v1331_v33 = vpop.f32.mrf.mxu1 }
 0x692   :  { %v1341_v36 = vsub.f32 %v1310_v51, %v1331_v33  ;;  %v588_v0 = vsub.f32 %v1331_v33, %v1310_v51 }
 0x693   :  { %v1333_v34 = vpop.f32.mrf.mxu1 }
 0x694   :  { %v1337_v35 = vsub.f32 %v1306_v50, %v1333_v34  ;;  %v587_v62 = vsub.f32 %v1333_v34, %v1306_v50  ;;  %v590_v8 = vmul.f32 %v588_v0, %v588_v0 }
 0x696   :  { %1068 = vmatprep.mubr.msk.f32.mxu0 %vm58_vm0, %v1337_v35  ;;  %v589_v4 = vmul.f32 %v587_v62, %v587_v62  ;;  %v592_v15 = vsel %vm58_vm0, %v590_v8, 0.0 }
 0x697   :  { %1069 = vmatmul.mubr.msk.f32.vlgmr.msra.gmra.mxu0 %vm58_vm0, %v1341_v36 }
 0x698   :  { %v579_v37 = vpop.f32.mrf.mxu0  ;;  %1084 = vmatprep.mubr.msk.bf16.mxu0 %vm1224_vm5, %v1223_v29  ;;  %v591_v2 = vsel %vm58_vm0, %v589_v4, 0.0 }
 0x699   :  { %v1092_v38 = vtrunc.f32 %v579_v37  ;;  %v593_v16 = vadd.f32 %v592_v15, %v591_v2 }
 0x69a   :  { %v1058_v39 = vpop.f32.mrf.mxu0 }
 0x69b   :  { %v1093_v41 = vcvt.f32.s32 %v1092_v38 }
 0x69c   :  { %v582_v42 = vpop.f32.mrf.mxu0 }
 0x69d   :  { %586 = vst.msk [vmem:[#allocation8 + $0x1] sm:$0x1] %vm308_vm9, %v1093_v41 }
 0x69e   :  { %v1059_v44 = vpop.f32.mrf.mxu0 }
 0x757   :  { %v1070_v47 = vpop.f32.mrf.mxu0 }
 0x758   :  { %v703_v52 = vsub.f32 %v955_v46, %v1070_v47 }
 0x759   :  { %v685_v53 = vpop.f32.mrf.mxu0 }
 0x75a   :  { %v702_v54 = vsub.f32 %v955_v46, %v685_v53  ;;  %706 = vmin.xlane.f32.xlu1 %v703_v52 }
 0x75c   :  { %704 = vmin.xlane.f32.xlu0 %v702_v54 }
 0x7e3   :  { %v707_v55 = vpop.xlane.xlu1 %706 }
 0x7e4   :  { %vm709_vm2 = vcmp.eq.f32.partialorder %v703_v52, %v707_v55 }
 0x7e5   :  { %v711_v29 = vsel %vm709_vm2, %v1283_v12, 128  ;;  %v705_v56 = vpop.xlane.xlu0 %704 }
 0x7e6   :  { %vm708_vm3 = vcmp.eq.f32.partialorder %v702_v54, %v705_v56  ;;  %v727_v57 = vshra.s32 %v711_v29, 16  ;;  %v726_v1 = vand.u32 65535, %v711_v29 }
 0x7e7   :  { %v710_v58 = vsel %vm708_vm3, %v1283_v12, 128 }
 0x7e8   :  { %v729_v59 = vcvt.s32.f32 %v727_v57  ;;  %v713_v60 = vshra.s32 %v710_v58, 16  ;;  %v712_v6 = vand.u32 65535, %v710_v58  ;;  %v728_v10 = vcvt.s32.f32 %v726_v1 }
 0x7ea   :  { %730 = vmin.xlane.f32.xlu1 %v729_v59  ;;  %v715_v61 = vcvt.s32.f32 %v713_v60  ;;  %v714_v14 = vcvt.s32.f32 %v712_v6 }
 0x7ec   :  { %716 = vmin.xlane.f32.xlu0 %v715_v61 }
 0x873   :  { %v731_v9 = vpop.xlane.xlu1 %730 }
 0x874   :  { %vm732_vm4 = vcmp.eq.f32.partialorder %v729_v59, %v731_v9  ;;  %v737_v19 = vcvt.f32.s32 %v731_v9 }
 0x875   :  { %v717_v13 = vpop.xlane.xlu0 %716  ;;  %v733_v50 = vsel %vm732_vm4, %v728_v10, inf }
 0x876   :  { %734 = vmin.xlane.f32.xlu1 %v733_v50  ;;  %vm718_vm5 = vcmp.eq.f32.partialorder %v715_v61, %v717_v13  ;;  %v723_v20 = vcvt.f32.s32 %v717_v13  ;;  %v738_v22 = vshll.u32 %v737_v19, 16 }
 0x877   :  { %v719_v51 = vsel %vm718_vm5, %v714_v14, inf }
 0x878   :  { %720 = vmin.xlane.f32.xlu0 %v719_v51  ;;  %v724_v25 = vshll.u32 %v723_v20, 16 }
 0x87a   :  { %594 = vadd.xlane.f32.xlu1 %v593_v16 }
 0x87c   :  { %317 = vadd.xlane.f32.xlu0 %v316_v18 }
 0x8ff   :  { %v735_v21 = vpop.xlane.xlu1 %734 }
 0x900   :  { %v736_v23 = vcvt.f32.s32 %v735_v21 }
 0x901   :  { %v721_v24 = vpop.xlane.xlu0 %720 }
 0x902   :  { %v739_v26 = vadd.s32 %v738_v22, %v736_v23  ;;  %v722_v27 = vcvt.f32.s32 %v721_v24 }
 0x903   :  { %v595_v28 = vpop.xlane.xlu1 %594 }
 0x904   :  { %v725_v30 = vadd.s32 %v724_v25, %v722_v27  ;;  %v596_v31 = vrot.slane %v595_v28, 4  ;;  %vm741_vm6 = vcmp.eq.s32.totalorder %v1283_v12, %v739_v26 }
 0x905   :  { %v318_v32 = vpop.xlane.xlu0 %317 }
 0x906   :  { %v597_v37 = vadd.f32 %v596_v31, %v595_v28  ;;  %v319_v38 = vrot.slane %v318_v32, 4  ;;  %vm740_vm7 = vcmp.eq.s32.totalorder %v1283_v12, %v725_v30  ;;  %v605_v12 = vadd.f32 %v1331_v33, %v1300_v48 }
 0x907   :  { %1079 = vmatprep.mubr.msk.f32.mxu1 %vm740_vm7, %v1225_v40  ;;  %vm960_vm8 = vmpackc.low %vm741_vm6, %vm740_vm7 }
 0x908   :  { %v598_v39 = vrot.slane %v597_v37, 2  ;;  %v320_v41 = vadd.f32 %v319_v38, %v318_v32  ;;  %1080 = vmatmul.mubr.msk.f32.vlgmr.msra.gmra.mxu1 %vm741_vm6, %v1225_v40  ;;  %1083 = vmatpush3.bf16.xpose.msk.msra.mxu0 %vm960_vm8, %v1226_v43  ;;  %v604_v43 = vadd.f32 %v1333_v34, %v1302_v49 }
 0x90a   :  { %v599_v42 = vadd.f32 %v598_v39, %v597_v37  ;;  %v321_v44 = vrot.slane %v320_v41, 2 }
 0x90c   :  { %v322_v46 = vadd.f32 %v321_v44, %v320_v41  ;;  %v600_v47 = vrot.slane %v599_v42, 1 }
 0x90e   :  { %v323_v52 = vrot.slane %v322_v46, 1  ;;  %v601_v54 = vadd.f32 %v600_v47, %v599_v42 }
 0x90f   :  { %1085 = vmatmul.mubr.bf16.vlgmr.msra.gmra.mxu0 %v1296_v45 }
 0x910   :  { %v324_v53 = vadd.f32 %v323_v52, %v322_v46 }
 0x912   :  { %1090 = vpush %v324_v53 }
 0x913   :  { %1094 = vpush %v601_v54 }
 0x9c8   :  { %v1081_v55 = vpop.f32.mrf.mxu1 }
 0x9c9   :  { %v865_v29 = vsub.f32 %v1081_v55, %v1341_v36  ;;  %v882_v40 = vadd.f32 %v1081_v55, %v605_v12 }
 0x9ca   :  { %v812_v56 = vpop.f32.mrf.mxu1 }
 0x9cb   :  { %v867_v57 = vmul.f32 %v865_v29, %v865_v29  ;;  %884 = vst.msk [vmem:[#allocation7 + $0x8] sm:$0xff] %vm58_vm0, %v882_v40  ;;  %v864_v45 = vsub.f32 %v812_v56, %v1337_v35  ;;  %v881_v58 = vadd.f32 %v812_v56, %v604_v43 }
 0x9cd   :  { %v866_v59 = vmul.f32 %v864_v45, %v864_v45  ;;  %883 = vst.msk [vmem:[#allocation7] sm:$0xff] %vm58_vm0, %v881_v58  ;;  %v869_v48 = vsel %vm58_vm0, %v867_v57, 0.0 }
 0x9cf   :  { %v868_v60 = vsel %vm58_vm0, %v866_v59, 0.0  ;;  %v856_v36 = vpop.f32.mrf.mxu0 }
 0x9d0   :  { %v870_v33 = vadd.f32 %v869_v48, %v868_v60  ;;  %v1096_v61 = vtrunc.f32 %v856_v36 }
 0x9d1   :  { %v1086_v62 = vpop.f32.mrf.mxu0 }
 0x9d2   :  { %871 = vadd.xlane.f32.xlu0 %v870_v33  ;;  %v1097_v49 = vcvt.f32.s32 %v1096_v61 }
 0x9d3   :  { %v859_v34 = vpop.f32.mrf.mxu0 }
 0x9d4   :  { %863 = vst.msk [vmem:[#allocation8 + $0x2] sm:$0x1] %vm308_vm9, %v1097_v49 }
 0x9d5   :  { %v1087_v63 = vpop.f32.mrf.mxu0 }
 0x9d6   :  { %1162 = shalt.err (!%p1159_p0)
}
 0x9d7   :  { %909 = dma.vmem_to_hbm [thread:$0]  %s907_s9, 64, %s1400_s4, [#allocation9]  }
 0x9d8   :  { %s1171_s15 = scalar_lea.vmem %s894_s11, 256  ;;  %p1176_p2 = scmp.lt.s32.totalorder %s894_s11, %s894_s11 }
 0x9d9   :  { %p1172_p1 = scmp.ne.s32.totalorder %s894_s11, %s1171_s15  ;;  %p1177_p3 = scmp.lt.s32.totalorder %s1171_s15, %s1171_s15 }
 0x9db   :  { %p1178_p4 = por %p1177_p3, %p1176_p2 }
 0x9dd   :  { %p1179_p5 = pnand %p1178_p4, %p1172_p1 }
 0x9df   :  { %1182 = shalt.err (!%p1179_p5)
}
 0x9e0   :  { %899 = dma.vmem_to_hbm [thread:$0]  %s894_s11, 256, %s1399_s3, [#allocation4], %s1220_s21, %s1220_s21, %s1221_s22  }
 0x9e1   :  { %s1091_s4 = spop %1090  ;;  %s1229_s20 = smov [#allocation10]  }
 0x9e2   :  { %s1095_s18 = spop %1094  ;;  %s916_s23 = sshll.u32 %s1229_s20, 4  ;;  %s917_s23 = int_to_ptr.vmem [resolvable:$true] %s916_s23 }
 0x9e3   :  { %s603_s19 = sadd.f32 %s1095_s18, %s1091_s4  ;;  %s1191_s26 = scalar_lea.vmem %s917_s23, 128 }
 0x9e4   :  { %p1192_p6 = scmp.ne.s32.totalorder %s917_s23, %s1191_s26  ;;  %p1196_p7 = scmp.lt.s32.totalorder %s917_s23, %s917_s23 }
 0x9e5   :  { %p1197_p8 = scmp.lt.s32.totalorder %s1191_s26, %s1191_s26 }
 0x9e7   :  { %p1198_p9 = por %p1197_p8, %p1196_p7 }
 0x9e9   :  { %p1199_p10 = pnand %p1198_p9, %p1192_p6 }
 0xa5b   :  { %v872_v35 = vpop.xlane.xlu0 %871 }
 0xa5c   :  { %v873_v0 = vrot.slane %v872_v35, 4 }
 0xa5e   :  { %v874_v1 = vadd.f32 %v873_v0, %v872_v35 }
 0xa60   :  { %v875_v3 = vrot.slane %v874_v1, 2 }
 0xa62   :  { %v876_v4 = vadd.f32 %v875_v3, %v874_v1 }
 0xa64   :  { %v877_v6 = vrot.slane %v876_v4, 1 }
 0xa66   :  { %v878_v7 = vadd.f32 %v877_v6, %v876_v4 }
 0xa68   :  { %1098 = vpush %v878_v7 }
 0xa99   :  { %s1099_s24 = spop %1098 }
 0xa9a   :  { %s880_s25 = sadd.f32 %s1099_s24, %s603_s19 }
 0xa9c   :  { %v885_v8 = vstv %s880_s25 }
 0xa9d   :  { %887 = vst [vmem:[#allocation10] sm:$0xff] %v885_v8 }
 0xa9e   :  { %1202 = shalt.err (!%p1199_p10)
}
 0xa9f   :  { %919 = dma.vmem_to_hbm [thread:$0]  %s917_s23, 128, %s1401_s5, [#allocation9]  }
 0xaa0   :  { %1215 = dma.done.wait [#allocation4], 256  }
 0xaa1   :  { %1216 = vsyncadd [#allocation4], 4294967040 }
 0xaa2   :  { %1217 = dma.done.wait [#allocation9], 192  }
 0xaa3   :  { %1218 = vsyncadd [#allocation9], 4294967104 }
 0xaa4   :  { %929 = vsyncpa [#allocation3], 1 }
 0xaa5   :  { %930 = vsyncpa [#allocation6], 1 }
 0xaa6   :  { %931 = vsyncpa [#allocation4], 1 }
 0xaa7   :  { %932 = vsyncpa [#allocation9], 1 }

</bundles_post_ra>
